<compile_context>
chip_gen: v7x
topology: tpu7x:2x2x1
jax: 0.10.0
libtpu: 0.0.40
codegen_flags: <defaults>
</compile_context>

<pallas_src>
import math

import jax
import jax.numpy as jnp
from jax.experimental import pallas as pl
from jax.experimental.pallas import tpu as pltpu


def _sublane_multiple(itemsize: int) -> int:
    # f32 -> 8 rows per vreg, bf16 -> 16, int8/fp8 -> 32.
    return {4: 8, 2: 16, 1: 32}.get(itemsize, 8)


def _select_tuning():
    """(target_block_bytes, vmem_limit_bytes) per TPU generation, safe fallback."""
    target, vmem_limit = 2 * 1024 * 1024, 32 * 1024 * 1024      # v5e / v6e
    is_v7 = False
    try:
        kind = jax.devices()[0].device_kind.lower()
        is_v7 = ("v7" in kind) or ("tpu7" in kind)
    except Exception:
        pass
    if not is_v7:
        try:   # v7x is the only generation with <= 64 MiB per-TC VMEM
            cap = getattr(pltpu.get_tpu_info(), "vmem_capacity_bytes", None)
            is_v7 = cap is not None and cap <= 64 * 1024 * 1024
        except Exception:
            pass
    if is_v7:
        target, vmem_limit = 8 * 1024 * 1024, 48 * 1024 * 1024
    return target, vmem_limit


def _choose_row_tile(n_rows: int, row_bytes: int, sub: int, target_bytes: int) -> int:
    """Row tile: multiple of the sublane count, near target_bytes, preferring an
    exact divisor of n_rows (avoids a masked / overhead-dominated tail block)."""
    ts = max(target_bytes // max(row_bytes, 1), 1)
    ts = max((ts // sub) * sub, sub)
    if ts >= n_rows:
        return n_rows
    if n_rows % ts != 0:
        t = ts
        while t >= sub:
            if n_rows % t == 0:
                if 2 * t >= ts:          # accept only if >= half the target size
                    ts = t
                break
            t -= sub
    return ts


def _add_pe_kernel(x_ref, pe_ref, o_ref):
    # pe_ref is (1, L): broadcast over the row (sublane) axis of the x block.
    o_ref[...] = x_ref[...].astype(o_ref.dtype) + pe_ref[...].astype(o_ref.dtype)


def _broadcast_add_rows(x2d, pe2d, out_dtype, *, target_bytes, vmem_limit,
                        cost_estimate, alias):
    n_rows, L = x2d.shape
    sub = max(_sublane_multiple(jnp.dtype(x2d.dtype).itemsize),
              _sublane_multiple(jnp.dtype(out_dtype).itemsize))
    row_bytes = L * max(jnp.dtype(x2d.dtype).itemsize,
                        jnp.dtype(out_dtype).itemsize)
    ts = _choose_row_tile(n_rows, row_bytes, sub, target_bytes)
    return pl.pallas_call(
        _add_pe_kernel,
        out_shape=jax.ShapeDtypeStruct((n_rows, L), out_dtype),
        grid=(pl.cdiv(n_rows, ts),),
        in_specs=[
            pl.BlockSpec((ts, L), lambda i: (i, 0)),
            pl.BlockSpec((1, L), lambda i: (0, 0)),   # constant -> DMA'd exactly once
        ],
        out_specs=pl.BlockSpec((ts, L), lambda i: (i, 0)),
        input_output_aliases={0: 0} if alias else {},
        compiler_params=pltpu.CompilerParams(
            dimension_semantics=("parallel",),
            vmem_limit_bytes=vmem_limit),
        cost_estimate=cost_estimate,
    )(x2d, pe2d)


def learned_positional_encoding(x: jax.Array, pe: jax.Array,
                                *, alias_x_to_output: bool = False) -> jax.Array:
    """out[b, s, d] = x[b, s, d] + pe[0, seq_len, d]   (seq_len = x.shape[1]).

    Set alias_x_to_output=True (and donate x at the jit level) to let the
    output reuse x's HBM buffer (requires x.dtype == result dtype).
    """
    B, S, D = x.shape
    assert pe.ndim == 3 and pe.shape[0] == 1 and pe.shape[2] == D
    assert S < pe.shape[1], "pe[:, seq_len] requires seq_len < max_seq_len"

    out_dtype = jnp.result_type(x.dtype, pe.dtype)   # PyTorch-style promotion
    if alias_x_to_output:
        assert out_dtype == jnp.dtype(x.dtype), "output aliasing needs matching dtypes"

    target_bytes, vmem_limit = _select_tuning()
    cost = pl.CostEstimate(
        flops=B * S * D,
        transcendentals=0,
        bytes_accessed=B * S * D * (jnp.dtype(x.dtype).itemsize
                                    + jnp.dtype(out_dtype).itemsize)
        + D * jnp.dtype(pe.dtype).itemsize,
    )
    common = dict(target_bytes=target_bytes, vmem_limit=vmem_limit,
                  cost_estimate=cost, alias=alias_x_to_output)

    pe_row = pe[0, S]                 # (D,) -- static slice, seq_len is a Python int

    if D % 128 == 0:
        # Rows already lane-dense; merge (B, S) into one streamed row axis.
        out2d = _broadcast_add_rows(x.reshape(B * S, D), pe_row[None, :],
                                    out_dtype, **common)
        return out2d.reshape(B, S, D)

    period = math.lcm(D, 128)
    if (B * S * D) % period == 0:
        # Lane-dense re-layout: rows of length lcm(D, 128).  Every row starts
        # at a flat offset that is a multiple of D, so one tiny pe period
        # broadcasts over all rows inside the kernel.
        n_rows = (B * S * D) // period
        pe_period = jnp.tile(pe_row, period // D)[None, :]      # (1, period)
        out2d = _broadcast_add_rows(x.reshape(n_rows, period), pe_period,
                                    out_dtype, **common)
        return out2d.reshape(B, S, D)

    # Fallback: no clean lane-dense re-layout (B*S*D not divisible by
    # lcm(D, 128)).  Correct, but stores are masked (last dim < 128 / ragged).
    # TODO(synk): pad / split remainder rows to recover full lane density.
    out2d = _broadcast_add_rows(x.reshape(B * S, D), pe_row[None, :],
                                out_dtype, **common)
    return out2d.reshape(B, S, D)


if __name__ == "__main__":
    key = jax.random.PRNGKey(0)
    k1, k2, k3, k4, k5, k6, k7, k8 = jax.random.split(key, 8)

    # Case 1: D=32 (not a multiple of 128) -> lane-dense periodic re-layout.
    B, S, D, MAX = 2, 8, 32, 128
    x = jax.random.normal(k1, (B, S, D), dtype=jnp.float32)
    pe = 0.02 * jax.random.normal(k2, (1, MAX, D), dtype=jnp.float32)
    out = jax.block_until_ready(learned_positional_encoding(x, pe))
    ref = x + pe[:, S]                                # exact PyTorch semantics
    assert out.shape == (B, S, D) and out.dtype == jnp.float32
    assert jnp.allclose(out, ref, atol=1e-6, rtol=1e-6)

    # Case 2: D=128 (lane-aligned) -> merged (B*S, D) row streaming.
    B2, S2, D2, MAX2 = 2, 16, 128, 64
    x2 = jax.random.normal(k3, (B2, S2, D2), dtype=jnp.float32)
    pe2 = 0.02 * jax.random.normal(k4, (1, MAX2, D2), dtype=jnp.float32)
    out2 = jax.block_until_ready(learned_positional_encoding(x2, pe2))
    ref2 = x2 + pe2[:, S2]
    assert out2.shape == (B2, S2, D2)
    assert jnp.allclose(out2, ref2, atol=1e-6, rtol=1e-6)

    # Case 3: ragged fallback (B*S*D not divisible by lcm(D, 128)).
    B3, S3, D3, MAX3 = 1, 3, 48, 16
    x3 = jax.random.normal(k5, (B3, S3, D3), dtype=jnp.float32)
    pe3 = 0.02 * jax.random.normal(k6, (1, MAX3, D3), dtype=jnp.float32)
    out3 = jax.block_until_ready(learned_positional_encoding(x3, pe3))
    ref3 = x3 + pe3[:, S3]
    assert out3.shape == (B3, S3, D3)
    assert jnp.allclose(out3, ref3, atol=1e-6, rtol=1e-6)

    # Case 4: mixed precision (bf16 x + f32 pe) promotes to f32, like PyTorch.
    B4, S4, D4, MAX4 = 2, 8, 128, 32
    x4 = jax.random.normal(k7, (B4, S4, D4), dtype=jnp.bfloat16)
    pe4 = 0.02 * jax.random.normal(k8, (1, MAX4, D4), dtype=jnp.float32)
    out4 = jax.block_until_ready(learned_positional_encoding(x4, pe4))
    ref4 = x4 + pe4[:, S4]                            # jnp promotes to f32 too
    assert out4.shape == (B4, S4, D4) and out4.dtype == jnp.float32
    assert jnp.allclose(out4, ref4, atol=1e-6, rtol=1e-6)

    print("KERNEL_OK")
</pallas_src>

<mosaic_0001>
module attributes {stable_mosaic.version = 11 : i64} {
  func.func @_add_pe_kernel(%arg0: i32, %arg1: memref<4x128xf32, #tpu.memory_space<vmem>>, %arg2: memref<1x128xf32, #tpu.memory_space<vmem>>, %arg3: memref<4x128xf32, #tpu.memory_space<vmem>>) attributes {dimension_semantics = [#tpu.dimension_semantics<parallel>], iteration_bounds = array<i64: 1>, scalar_prefetch = 0 : i64, scratch_operands = 0 : i64, tpu.core_type = #tpu.core_type<tc>, window_params = [{transform_indices = @transform_0, window_bounds = array<i64: 4, 128>}, {pipeline_mode = #tpu.pipeline_mode<synchronous>, transform_indices = @transform_1, window_bounds = array<i64: 1, 128>}, {transform_indices = @transform_2, window_bounds = array<i64: 4, 128>}]} {
    %c0 = arith.constant 0 : index
    %c0_0 = arith.constant 0 : index
    %0 = vector.load %arg1[%c0, %c0_0] : memref<4x128xf32, #tpu.memory_space<vmem>>, vector<4x128xf32>
    %c0_1 = arith.constant 0 : index
    %c0_2 = arith.constant 0 : index
    %1 = vector.load %arg2[%c0_1, %c0_2] : memref<1x128xf32, #tpu.memory_space<vmem>>, vector<1x128xf32>
    %2 = vector.broadcast %1 : vector<1x128xf32> to vector<4x128xf32>
    %3 = arith.addf %0, %2 : vector<4x128xf32>
    %c0_3 = arith.constant 0 : index
    %c0_4 = arith.constant 0 : index
    %4 = vector.load %arg3[%c0_3, %c0_4] : memref<4x128xf32, #tpu.memory_space<vmem>>, vector<4x128xf32>
    tpu.vector_store %arg3[%c0_3, %c0_4], %3 {strides = array<i32>} : memref<4x128xf32, #tpu.memory_space<vmem>>, vector<4x128xf32>,
    return
  }
  func.func @transform_0(%arg0: i32) -> (i32, i32) {
    %c0_i32 = arith.constant 0 : i32
    %c0_i32_0 = arith.constant 0 : i32
    return %arg0, %c0_i32 : i32, i32
  }
  func.func @transform_1(%arg0: i32) -> (i32, i32) {
    %c0_i32 = arith.constant 0 : i32
    %c0_i32_0 = arith.constant 0 : i32
    %c0_i32_1 = arith.constant 0 : i32
    return %c0_i32, %c0_i32_0 : i32, i32
  }
  func.func @transform_2(%arg0: i32) -> (i32, i32) {
    %c0_i32 = arith.constant 0 : i32
    %c0_i32_0 = arith.constant 0 : i32
    return %arg0, %c0_i32 : i32, i32
  }
}

</mosaic_0001>

<bundles_post_ra>
// kernel: tpu_custom_call.1
= control target key start
LH: loop header
LB: loop body
LE: loop exit
PB: predicated region body
PF: predicated region fallthrough
CT: control target
= control target key end

     0   :  { %7 = vsyncpa [#allocation3], 0  ;;  %s144_s0 = inlined_call_operand.hbm [shape: f32[4,128], index: 0, kind: input, shape index: {}]   ;;  %s145_s1 = inlined_call_operand.vmem [shape: f32[1,128], index: 1, kind: input, shape index: {}]   ;;  %s146_s2 = inlined_call_operand.hbm [shape: f32[4,128], index: 2, kind: output, shape index: {}]  }
   0x1   :  { %8 = vsyncpa [#allocation4], 0  ;;  %s100_s9 = smov [#allocation2]   ;;  %s52_s13 = scalar_lea.hbm %s144_s0, 64 }
   0x2   :  { %s15_s10 = sshll.u32 %s100_s9, 4  ;;  %p53_p0 = scmp.ne.s32.totalorder %s144_s0, %s52_s13  ;;  %s16_s10 = int_to_ptr.vmem [resolvable:$true] %s15_s10 }
   0x3   :  { %p56_p1 = scmp.lt.u32.totalorder %s52_s13, %s144_s0 }
   0x5   :  { %p58_p2 = pnand %p56_p1, %p53_p0 }
   0x7   :  { %61 = shalt.err (!%p58_p2)
}
   0x8   :  { %s62_s18 = scalar_lea.vmem %s16_s10, 64  ;;  %p67_p4 = scmp.lt.s32.totalorder %s16_s10, %s16_s10 }
   0x9   :  { %p63_p3 = scmp.ne.s32.totalorder %s16_s10, %s62_s18  ;;  %p68_p5 = scmp.lt.s32.totalorder %s62_s18, %s62_s18 }
   0xb   :  { %p69_p6 = por %p68_p5, %p67_p4 }
   0xd   :  { %p70_p7 = pnand %p69_p6, %p63_p3 }
   0xf   :  { %73 = shalt.err (!%p70_p7)
}
  0x10   :  { %18 = dma.hbm_to_vmem [thread:$0]  %s144_s0, 64, %s16_s10, [#allocation3]  }
  0x11   :  { %96 = dma.done.wait [#allocation3], 64  }
  0x12   :  { %97 = vsyncadd [#allocation3], 4294967232  ;;  %s101_s21 = smov [#allocation5]   ;;  %v24_v0 = vld [vmem:[#allocation2] sm:$0xf] }
  0x13   :  { %s40_s22 = sshll.u32 %s101_s21, 4  ;;  %v49_v1 = vld [vmem:[%s145_s1] ss:$0 sm:$0xff]  ;;  %s41_s22 = int_to_ptr.vmem [resolvable:$true] %s40_s22 }
  0x14   :  { %v32_v2 = vadd.f32 %v49_v1, %v24_v0  ;;  %s74_s25 = scalar_lea.vmem %s41_s22, 64  ;;  %p79_p9 = scmp.lt.s32.totalorder %s41_s22, %s41_s22 }
  0x15   :  { %p75_p8 = scmp.ne.s32.totalorder %s41_s22, %s74_s25  ;;  %p80_p10 = scmp.lt.s32.totalorder %s74_s25, %s74_s25 }
  0x16   :  { %33 = vst [vmem:[#allocation5] sm:$0xf] %v32_v2 }
  0x17   :  { %p81_p11 = por %p80_p10, %p79_p9 }
  0x19   :  { %p82_p12 = pnand %p81_p11, %p75_p8 }
  0x1b   :  { %85 = shalt.err (!%p82_p12)
}
  0x1c   :  { %s86_s27 = scalar_lea.hbm %s146_s2, 64 }
  0x1d   :  { %p87_p13 = scmp.ne.s32.totalorder %s146_s2, %s86_s27  ;;  %p90_p0 = scmp.lt.u32.totalorder %s86_s27, %s146_s2 }
  0x1f   :  { %p92_p1 = pnand %p90_p0, %p87_p13 }
  0x21   :  { %95 = shalt.err (!%p92_p1)
}
  0x22   :  { %43 = dma.vmem_to_hbm [thread:$0]  %s41_s22, 64, %s146_s2, [#allocation4]  }
  0x23   :  { %98 = dma.done.wait [#allocation4], 64  }
  0x24   :  { %99 = vsyncadd [#allocation4], 4294967232 }
  0x25   :  { %47 = vsyncpa [#allocation3], 1 }
  0x26   :  { %48 = vsyncpa [#allocation4], 1 }

</bundles_post_ra>
